<compile_context>
chip_gen: v7x
topology: tpu7x:2x2x1
jax: 0.10.0
libtpu: 0.0.40
codegen_flags: <defaults>
</compile_context>

<pallas_src>
import functools

import jax
import jax.numpy as jnp
from jax.experimental import pallas as pl
from jax.experimental.pallas import tpu as pltpu


# ------------------------------------------------------------------ kernels --

def _conv_stats_kernel(w_ref, x_ref, m_ref, conv_ref, stats_ref, acc_ref,
                       *, kh, kw, stride, wp, cnt):
    """Shift-and-accumulate conv GEMM with fused BN partial statistics.

    w_ref    : (KH*KW, Cout, TCin)  per-tap weight matrices
    x_ref    : (1, TCin, HP*WP)     flattened padded input slab for one image
    m_ref    : (1, L)               validity mask over the wide spatial axis
    conv_ref : (1, Cout, L)         wide conv output (lane-dense)
    stats_ref: (1, Cout, 2)         [sum, centred-M2] per image/channel
    acc_ref  : (Cout, L) f32        VMEM accumulator across the Cin grid axis
    """
    c = pl.program_id(1)
    l = acc_ref.shape[1]

    # KH*KW sub-GEMMs against lane-shifted (stride-strided for stride > 1)
    # views of the padded input in VMEM; all dot operands are strictly 2-D.
    part = None
    for t in range(kh * kw):
        i, j = divmod(t, kw)
        base = i * wp + j                      # static lane offset of tap (i, j)
        if stride == 1:
            slab = x_ref[0, :, pl.ds(base, l)]
        else:
            slab = x_ref[0, :, pl.ds(base, l, stride=stride)]
        contrib = jnp.dot(w_ref[t], slab, preferred_element_type=jnp.float32)
        part = contrib if part is None else part + contrib

    @pl.when(c == 0)
    def _():
        acc_ref[...] = part

    @pl.when(c > 0)
    def _():
        acc_ref[...] += part

    @pl.when(c == pl.num_programs(1) - 1)
    def _():
        y = acc_ref[...]
        conv_ref[0] = y
        # BN partial statistics, masked to the valid output columns and
        # centred per image (shifted sums -> no E[x^2]-E[x]^2 cancellation).
        m = m_ref[...]                                # (1, L)
        s = jnp.sum(y * m, axis=1, keepdims=True)     # (Cout, 1)
        mu = s * (1.0 / cnt)
        d = (y - mu) * m
        m2 = jnp.sum(d * d, axis=1, keepdims=True)
        stats_ref[0, :, 0:1] = s
        stats_ref[0, :, 1:2] = m2


def _bn_relu_kernel(x_ref, scale_ref, shift_ref, o_ref):
    """Folded BatchNorm affine + ReLU on wide lane-dense tiles (f32 VPU)."""
    o_ref[...] = jnp.maximum(x_ref[...] * scale_ref[...] + shift_ref[...], 0.0)


# ------------------------------------------------------------------ helpers --

def _vmem_limit_bytes():
    """Generation-aware scoped-VMEM limit with headroom for Mosaic scratch."""
    phys = 128 * 1024 * 1024
    try:
        info = pltpu.get_tpu_info()
        phys = int(getattr(info, "vmem_capacity_bytes", phys))
    except Exception:
        pass
    # v7x (64 MiB physical) -> 48 MiB; v5e/v6e (128 MiB) -> 96 MiB.
    return max(32 * 1024 * 1024, min(phys * 3 // 4, 100 * 1024 * 1024))


def _pick_cin_tile(cin, hpwp, cout, l, kh, kw, budget_bytes):
    """Largest Cin tile whose per-step VMEM footprint fits the budget."""
    def need(tc):
        x_blk = 2 * tc * hpwp * 4                # input block, double-buffered
        w_blk = 2 * kh * kw * cout * tc * 4      # weight block, double-buffered
        o_blk = 3 * cout * l * 4                 # conv out (x2 bufs) + acc scratch
        tmp = 4 * max(tc, cout) * l * 4          # slab / partial temporaries
        return x_blk + w_blk + o_blk + tmp

    if need(cin) <= budget_bytes:
        return cin
    tc = (cin // 128) * 128                      # weight last dim must stay 128-aligned
    while tc >= 128:
        if cin % tc == 0 and need(tc) <= budget_bytes:
            return tc
        tc -= 128
    # TODO(synk): spatial (halo) tiling for shapes where even one Cin slice
    # plus the per-image output slab exceeds the VMEM budget.
    return cin


def _pick_batch_tile(n, bytes_per_image, target_bytes=4 * 1024 * 1024):
    """Batch images per BN+ReLU grid step (multi-MiB steps) while keeping
    >= 2 parallel grid steps when N >= 2 (v7x dual-TensorCore)."""
    cap = max(1, target_bytes // max(1, bytes_per_image))
    if n >= 2:
        cap = min(cap, n // 2)
    cap = max(1, cap)
    nb = 1
    for d in range(1, n + 1):
        if n % d == 0 and d <= cap:
            nb = d
    return nb


# ------------------------------------------------------------------ wrapper --

@functools.partial(jax.jit, static_argnames=("stride", "padding"))
def my_cnn_decoder_forward(x, weight, bias, gamma, beta, *, stride, padding):
    """x: (N, Cin, H, W); weight: (Cout, Cin, KH, KW).  Returns NCHW output."""
    del bias  # per-channel conv bias cancels exactly under training-mode
              # batch-stat BN (not valid for eval-mode running statistics)
    n, cin, h, w = x.shape
    cout, _, kh, kw = weight.shape
    oh = (h + 2 * padding - kh) // stride + 1
    ow = (w + 2 * padding - kw) // stride + 1
    hp, wp = h + 2 * padding, w + 2 * padding
    hpwp = hp * wp
    l = (oh - 1) * wp + ow          # "wide" flattened spatial length (incl. gaps)
    cnt = oh * ow
    eps = 1e-5

    # XLA-side glue (cheap, ~input-sized): pad + flatten the input, re-pack the
    # weights per tap, and build the valid-column mask of the wide layout.
    xp_flat = jnp.pad(
        x, ((0, 0), (0, 0), (padding, padding), (padding, padding))
    ).reshape(n, cin, hpwp)
    w_taps = jnp.transpose(weight, (2, 3, 0, 1)).reshape(kh * kw, cout, cin)
    mask = (jnp.arange(l) % wp < ow).astype(jnp.float32).reshape(1, l)

    vmem_limit = _vmem_limit_bytes()
    tcin = _pick_cin_tile(cin, hpwp, cout, l, kh, kw, (vmem_limit * 3) // 5)
    n_ci = max(1, cin // tcin)

    # --- kernel 1: in-kernel conv (shift-and-accumulate) + BN partial stats --
    conv_wide, stats = pl.pallas_call(
        functools.partial(_conv_stats_kernel, kh=kh, kw=kw, stride=stride,
                          wp=wp, cnt=float(cnt)),
        out_shape=(
            jax.ShapeDtypeStruct((n, cout, l), jnp.float32),
            jax.ShapeDtypeStruct((n, cout, 2), jnp.float32),
        ),
        grid_spec=pltpu.PrefetchScalarGridSpec(
            num_scalar_prefetch=0,
            grid=(n, n_ci),
            in_specs=[
                pl.BlockSpec((kh * kw, cout, tcin), lambda b, c: (0, 0, c)),
                pl.BlockSpec((1, tcin, hpwp), lambda b, c: (b, c, 0)),
                pl.BlockSpec((1, l), lambda b, c: (0, 0)),
            ],
            out_specs=(
                pl.BlockSpec((1, cout, l), lambda b, c: (b, 0, 0)),
                pl.BlockSpec((1, cout, 2), lambda b, c: (b, 0, 0)),
            ),
            scratch_shapes=[pltpu.VMEM((cout, l), jnp.float32)],
        ),
        compiler_params=pltpu.CompilerParams(
            dimension_semantics=("parallel", "arbitrary"),
            vmem_limit_bytes=vmem_limit,
        ),
    )(w_taps, xp_flat, mask)

    # --- BN statistics: Chan-style combine of per-image shifted sums --------
    total = n * cnt
    s_b = stats[:, :, 0]                                    # (N, Cout)
    m2_b = stats[:, :, 1]
    mean = jnp.sum(s_b, axis=0) / total                     # (Cout,)
    mu_b = s_b / cnt
    m2 = jnp.sum(m2_b, axis=0) + cnt * jnp.sum((mu_b - mean[None, :]) ** 2, axis=0)
    var = jnp.maximum(m2 / total, 0.0)
    invstd = jax.lax.rsqrt(var + eps)
    scale = (gamma * invstd).reshape(1, cout, 1)
    shift = (beta - mean * gamma * invstd).reshape(1, cout, 1)

    # --- kernel 2: folded BN affine + ReLU (memory-bound, multi-image tiles) -
    nb = _pick_batch_tile(n, cout * l * 4 * 2)
    bn_wide = pl.pallas_call(
        _bn_relu_kernel,
        out_shape=jax.ShapeDtypeStruct((n, cout, l), jnp.float32),
        grid_spec=pltpu.PrefetchScalarGridSpec(
            num_scalar_prefetch=0,
            grid=(n // nb,),
            in_specs=[
                pl.BlockSpec((nb, cout, l), lambda b: (b, 0, 0)),
                pl.BlockSpec((1, cout, 1), lambda b: (0, 0, 0)),
                pl.BlockSpec((1, cout, 1), lambda b: (0, 0, 0)),
            ],
            out_specs=pl.BlockSpec((nb, cout, l), lambda b: (b, 0, 0)),
        ),
        compiler_params=pltpu.CompilerParams(
            dimension_semantics=("parallel",),
            vmem_limit_bytes=vmem_limit,
        ),
    )(conv_wide, scale, shift)

    # --- epilogue: drop the gap columns of the wide layout (one fused XLA
    # pad/reshape/slice, ~output-sized) and return NCHW. ----------------------
    out = jnp.pad(bn_wide, ((0, 0), (0, 0), (0, oh * wp - l)))
    out = out.reshape(n, cout, oh, wp)[:, :, :, :ow]
    return out


# -------------------------------------------------------------------- main --

if __name__ == "__main__":
    # Small config consistent with my_cnn_decoder(in=4, out=8, k=3, s=1, p=1)
    N, Cin, H, W = 2, 4, 16, 16
    Cout, Ksz, stride, padding = 8, 3, 1, 1

    key = jax.random.PRNGKey(0)
    kx, kw_, kb, kg, kbeta = jax.random.split(key, 5)

    x = jax.random.normal(kx, (N, Cin, H, W), dtype=jnp.float32)
    fan_in = Cin * Ksz * Ksz
    weight = jax.random.normal(kw_, (Cout, Cin, Ksz, Ksz), dtype=jnp.float32) / jnp.sqrt(fan_in)
    bias = jax.random.normal(kb, (Cout,), dtype=jnp.float32) * 0.1
    gamma = 1.0 + 0.1 * jax.random.normal(kg, (Cout,), dtype=jnp.float32)
    beta = 0.1 * jax.random.normal(kbeta, (Cout,), dtype=jnp.float32)

    out = my_cnn_decoder_forward(x, weight, bias, gamma, beta,
                                 stride=stride, padding=padding)
    out = jax.block_until_ready(out)

    # Pure-JAX reference: conv(+bias) -> BN(batch stats) -> ReLU.
    # (Bias is included here; it cancels under batch-stat BN, matching the kernel.)
    conv_ref = jax.lax.conv_general_dilated(
        x, weight, window_strides=(stride, stride),
        padding=((padding, padding), (padding, padding)),
        dimension_numbers=("NCHW", "OIHW", "NCHW"),
    ) + bias[None, :, None, None]
    mu = conv_ref.mean(axis=(0, 2, 3), keepdims=True)
    var = conv_ref.var(axis=(0, 2, 3), keepdims=True)
    bn_ref = (conv_ref - mu) * jax.lax.rsqrt(var + 1e-5) \
        * gamma[None, :, None, None] + beta[None, :, None, None]
    ref = jnp.maximum(bn_ref, 0.0)

    assert out.shape == (N, Cout, H, W)
    err = jnp.max(jnp.abs(out - ref))
    assert jnp.allclose(out, ref, atol=1e-3, rtol=1e-3), f"max abs err {err}"
    print("KERNEL_OK")
</pallas_src>

<mosaic_0001>
module attributes {stable_mosaic.version = 11 : i64} {
  func.func @_conv_stats_kernel(%arg0: i32, %arg1: i32, %arg2: memref<9x8x4xf32, #tpu.memory_space<vmem>>, %arg3: memref<1x4x324xf32, #tpu.memory_space<vmem>>, %arg4: memref<1x286xf32, #tpu.memory_space<vmem>>, %arg5: memref<1x8x286xf32, #tpu.memory_space<vmem>>, %arg6: memref<1x8x2xf32, #tpu.memory_space<vmem>>, %arg7: memref<8x286xf32, #tpu.memory_space<vmem>>) attributes {dimension_semantics = [#tpu.dimension_semantics<parallel>, #tpu.dimension_semantics<arbitrary>], iteration_bounds = array<i64: 2, 1>, scalar_prefetch = 0 : i64, scratch_operands = 1 : i64, tpu.core_type = #tpu.core_type<tc>, window_params = [{transform_indices = @transform_0, window_bounds = array<i64: 9, 8, 4>}, {transform_indices = @transform_1, window_bounds = array<i64: 1, 4, 324>}, {pipeline_mode = #tpu.pipeline_mode<synchronous>, transform_indices = @transform_2, window_bounds = array<i64: 1, 286>}, {transform_indices = @transform_3, window_bounds = array<i64: 1, 8, 286>}, {transform_indices = @transform_4, window_bounds = array<i64: 1, 8, 2>}]} {
    %c0 = arith.constant 0 : index
    %c0_0 = arith.constant 0 : index
    %c0_1 = arith.constant 0 : index
    %0 = vector.load %arg3[%c0, %c0_0, %c0_1] : memref<1x4x324xf32, #tpu.memory_space<vmem>>, vector<1x4x286xf32>
    %1 = vector.shape_cast %0 : vector<1x4x286xf32> to vector<4x286xf32>
    %c0_2 = arith.constant 0 : index
    %c0_3 = arith.constant 0 : index
    %c0_4 = arith.constant 0 : index
    %2 = vector.load %arg2[%c0_2, %c0_3, %c0_4] : memref<9x8x4xf32, #tpu.memory_space<vmem>>, vector<1x8x4xf32>
    %3 = vector.shape_cast %2 : vector<1x8x4xf32> to vector<8x4xf32>
    %cst = arith.constant dense<0.000000e+00> : vector<8x286xf32>
    %4 = tpu.matmul %3, %1, %cst {dimension_numbers = #tpu.dot_dimension_numbers<[1], [0], [0], [1], [0, 0, 1, 1], [], []>} : vector<8x4xf32>, vector<4x286xf32>, vector<8x286xf32> -> vector<8x286xf32>
    %c0_5 = arith.constant 0 : index
    %c0_6 = arith.constant 0 : index
    %c1 = arith.constant 1 : index
    %5 = vector.load %arg3[%c0_5, %c0_6, %c1] : memref<1x4x324xf32, #tpu.memory_space<vmem>>, vector<1x4x286xf32>
    %6 = vector.shape_cast %5 : vector<1x4x286xf32> to vector<4x286xf32>
    %c1_7 = arith.constant 1 : index
    %c0_8 = arith.constant 0 : index
    %c0_9 = arith.constant 0 : index
    %7 = vector.load %arg2[%c1_7, %c0_8, %c0_9] : memref<9x8x4xf32, #tpu.memory_space<vmem>>, vector<1x8x4xf32>
    %8 = vector.shape_cast %7 : vector<1x8x4xf32> to vector<8x4xf32>
    %cst_10 = arith.constant dense<0.000000e+00> : vector<8x286xf32>
    %9 = tpu.matmul %8, %6, %cst_10 {dimension_numbers = #tpu.dot_dimension_numbers<[1], [0], [0], [1], [0, 0, 1, 1], [], []>} : vector<8x4xf32>, vector<4x286xf32>, vector<8x286xf32> -> vector<8x286xf32>
    %10 = arith.addf %4, %9 : vector<8x286xf32>
    %c0_11 = arith.constant 0 : index
    %c0_12 = arith.constant 0 : index
    %c2 = arith.constant 2 : index
    %11 = vector.load %arg3[%c0_11, %c0_12, %c2] : memref<1x4x324xf32, #tpu.memory_space<vmem>>, vector<1x4x286xf32>
    %12 = vector.shape_cast %11 : vector<1x4x286xf32> to vector<4x286xf32>
    %c2_13 = arith.constant 2 : index
    %c0_14 = arith.constant 0 : index
    %c0_15 = arith.constant 0 : index
    %13 = vector.load %arg2[%c2_13, %c0_14, %c0_15] : memref<9x8x4xf32, #tpu.memory_space<vmem>>, vector<1x8x4xf32>
    %14 = vector.shape_cast %13 : vector<1x8x4xf32> to vector<8x4xf32>
    %cst_16 = arith.constant dense<0.000000e+00> : vector<8x286xf32>
    %15 = tpu.matmul %14, %12, %cst_16 {dimension_numbers = #tpu.dot_dimension_numbers<[1], [0], [0], [1], [0, 0, 1, 1], [], []>} : vector<8x4xf32>, vector<4x286xf32>, vector<8x286xf32> -> vector<8x286xf32>
    %16 = arith.addf %10, %15 : vector<8x286xf32>
    %c0_17 = arith.constant 0 : index
    %c0_18 = arith.constant 0 : index
    %c18 = arith.constant 18 : index
    %17 = vector.load %arg3[%c0_17, %c0_18, %c18] : memref<1x4x324xf32, #tpu.memory_space<vmem>>, vector<1x4x286xf32>
    %18 = vector.shape_cast %17 : vector<1x4x286xf32> to vector<4x286xf32>
    %c3 = arith.constant 3 : index
    %c0_19 = arith.constant 0 : index
    %c0_20 = arith.constant 0 : index
    %19 = vector.load %arg2[%c3, %c0_19, %c0_20] : memref<9x8x4xf32, #tpu.memory_space<vmem>>, vector<1x8x4xf32>
    %20 = vector.shape_cast %19 : vector<1x8x4xf32> to vector<8x4xf32>
    %cst_21 = arith.constant dense<0.000000e+00> : vector<8x286xf32>
    %21 = tpu.matmul %20, %18, %cst_21 {dimension_numbers = #tpu.dot_dimension_numbers<[1], [0], [0], [1], [0, 0, 1, 1], [], []>} : vector<8x4xf32>, vector<4x286xf32>, vector<8x286xf32> -> vector<8x286xf32>
    %22 = arith.addf %16, %21 : vector<8x286xf32>
    %c0_22 = arith.constant 0 : index
    %c0_23 = arith.constant 0 : index
    %c19 = arith.constant 19 : index
    %23 = vector.load %arg3[%c0_22, %c0_23, %c19] : memref<1x4x324xf32, #tpu.memory_space<vmem>>, vector<1x4x286xf32>
    %24 = vector.shape_cast %23 : vector<1x4x286xf32> to vector<4x286xf32>
    %c4 = arith.constant 4 : index
    %c0_24 = arith.constant 0 : index
    %c0_25 = arith.constant 0 : index
    %25 = vector.load %arg2[%c4, %c0_24, %c0_25] : memref<9x8x4xf32, #tpu.memory_space<vmem>>, vector<1x8x4xf32>
    %26 = vector.shape_cast %25 : vector<1x8x4xf32> to vector<8x4xf32>
    %cst_26 = arith.constant dense<0.000000e+00> : vector<8x286xf32>
    %27 = tpu.matmul %26, %24, %cst_26 {dimension_numbers = #tpu.dot_dimension_numbers<[1], [0], [0], [1], [0, 0, 1, 1], [], []>} : vector<8x4xf32>, vector<4x286xf32>, vector<8x286xf32> -> vector<8x286xf32>
    %28 = arith.addf %22, %27 : vector<8x286xf32>
    %c0_27 = arith.constant 0 : index
    %c0_28 = arith.constant 0 : index
    %c20 = arith.constant 20 : index
    %29 = vector.load %arg3[%c0_27, %c0_28, %c20] : memref<1x4x324xf32, #tpu.memory_space<vmem>>, vector<1x4x286xf32>
    %30 = vector.shape_cast %29 : vector<1x4x286xf32> to vector<4x286xf32>
    %c5 = arith.constant 5 : index
    %c0_29 = arith.constant 0 : index
    %c0_30 = arith.constant 0 : index
    %31 = vector.load %arg2[%c5, %c0_29, %c0_30] : memref<9x8x4xf32, #tpu.memory_space<vmem>>, vector<1x8x4xf32>
    %32 = vector.shape_cast %31 : vector<1x8x4xf32> to vector<8x4xf32>
    %cst_31 = arith.constant dense<0.000000e+00> : vector<8x286xf32>
    %33 = tpu.matmul %32, %30, %cst_31 {dimension_numbers = #tpu.dot_dimension_numbers<[1], [0], [0], [1], [0, 0, 1, 1], [], []>} : vector<8x4xf32>, vector<4x286xf32>, vector<8x286xf32> -> vector<8x286xf32>
    %34 = arith.addf %28, %33 : vector<8x286xf32>
    %c0_32 = arith.constant 0 : index
    %c0_33 = arith.constant 0 : index
    %c36 = arith.constant 36 : index
    %35 = vector.load %arg3[%c0_32, %c0_33, %c36] : memref<1x4x324xf32, #tpu.memory_space<vmem>>, vector<1x4x286xf32>
    %36 = vector.shape_cast %35 : vector<1x4x286xf32> to vector<4x286xf32>
    %c6 = arith.constant 6 : index
    %c0_34 = arith.constant 0 : index
    %c0_35 = arith.constant 0 : index
    %37 = vector.load %arg2[%c6, %c0_34, %c0_35] : memref<9x8x4xf32, #tpu.memory_space<vmem>>, vector<1x8x4xf32>
    %38 = vector.shape_cast %37 : vector<1x8x4xf32> to vector<8x4xf32>
    %cst_36 = arith.constant dense<0.000000e+00> : vector<8x286xf32>
    %39 = tpu.matmul %38, %36, %cst_36 {dimension_numbers = #tpu.dot_dimension_numbers<[1], [0], [0], [1], [0, 0, 1, 1], [], []>} : vector<8x4xf32>, vector<4x286xf32>, vector<8x286xf32> -> vector<8x286xf32>
    %40 = arith.addf %34, %39 : vector<8x286xf32>
    %c0_37 = arith.constant 0 : index
    %c0_38 = arith.constant 0 : index
    %c37 = arith.constant 37 : index
    %41 = vector.load %arg3[%c0_37, %c0_38, %c37] : memref<1x4x324xf32, #tpu.memory_space<vmem>>, vector<1x4x286xf32>
    %42 = vector.shape_cast %41 : vector<1x4x286xf32> to vector<4x286xf32>
    %c7 = arith.constant 7 : index
    %c0_39 = arith.constant 0 : index
    %c0_40 = arith.constant 0 : index
    %43 = vector.load %arg2[%c7, %c0_39, %c0_40] : memref<9x8x4xf32, #tpu.memory_space<vmem>>, vector<1x8x4xf32>
    %44 = vector.shape_cast %43 : vector<1x8x4xf32> to vector<8x4xf32>
    %cst_41 = arith.constant dense<0.000000e+00> : vector<8x286xf32>
    %45 = tpu.matmul %44, %42, %cst_41 {dimension_numbers = #tpu.dot_dimension_numbers<[1], [0], [0], [1], [0, 0, 1, 1], [], []>} : vector<8x4xf32>, vector<4x286xf32>, vector<8x286xf32> -> vector<8x286xf32>
    %46 = arith.addf %40, %45 : vector<8x286xf32>
    %c0_42 = arith.constant 0 : index
    %c0_43 = arith.constant 0 : index
    %c38 = arith.constant 38 : index
    %47 = vector.load %arg3[%c0_42, %c0_43, %c38] : memref<1x4x324xf32, #tpu.memory_space<vmem>>, vector<1x4x286xf32>
    %48 = vector.shape_cast %47 : vector<1x4x286xf32> to vector<4x286xf32>
    %c8 = arith.constant 8 : index
    %c0_44 = arith.constant 0 : index
    %c0_45 = arith.constant 0 : index
    %49 = vector.load %arg2[%c8, %c0_44, %c0_45] : memref<9x8x4xf32, #tpu.memory_space<vmem>>, vector<1x8x4xf32>
    %50 = vector.shape_cast %49 : vector<1x8x4xf32> to vector<8x4xf32>
    %cst_46 = arith.constant dense<0.000000e+00> : vector<8x286xf32>
    %51 = tpu.matmul %50, %48, %cst_46 {dimension_numbers = #tpu.dot_dimension_numbers<[1], [0], [0], [1], [0, 0, 1, 1], [], []>} : vector<8x4xf32>, vector<4x286xf32>, vector<8x286xf32> -> vector<8x286xf32>
    %52 = arith.addf %46, %51 : vector<8x286xf32>
    %c0_i32 = arith.constant 0 : i32
    %53 = arith.cmpi eq, %arg1, %c0_i32 : i32
    %54 = arith.extui %53 : i1 to i32
    %c0_i32_47 = arith.constant 0 : i32
    %55 = arith.cmpi ne, %54, %c0_i32_47 : i32
    scf.if %55 {
      %c0_52 = arith.constant 0 : index
      %c0_53 = arith.constant 0 : index
      %62 = vector.load %arg7[%c0_52, %c0_53] : memref<8x286xf32, #tpu.memory_space<vmem>>, vector<8x286xf32>
      tpu.vector_store %arg7[%c0_52, %c0_53], %52 {strides = array<i32>} : memref<8x286xf32, #tpu.memory_space<vmem>>, vector<8x286xf32>,
    } else {
    }
    %c0_i32_48 = arith.constant 0 : i32
    %56 = arith.cmpi sgt, %arg1, %c0_i32_48 : i32
    %57 = arith.extui %56 : i1 to i32
    %c0_i32_49 = arith.constant 0 : i32
    %58 = arith.cmpi ne, %57, %c0_i32_49 : i32
    scf.if %58 {
      %c0_52 = arith.constant 0 : index
      %c0_53 = arith.constant 0 : index
      %62 = vector.load %arg7[%c0_52, %c0_53] : memref<8x286xf32, #tpu.memory_space<vmem>>, vector<8x286xf32>
      %63 = arith.addf %62, %52 : vector<8x286xf32>
      %c0_54 = arith.constant 0 : index
      %c0_55 = arith.constant 0 : index
      %64 = vector.load %arg7[%c0_54, %c0_55] : memref<8x286xf32, #tpu.memory_space<vmem>>, vector<8x286xf32>
      tpu.vector_store %arg7[%c0_54, %c0_55], %63 {strides = array<i32>} : memref<8x286xf32, #tpu.memory_space<vmem>>, vector<8x286xf32>,
    } else {
    }
    %c0_i32_50 = arith.constant 0 : i32
    %59 = arith.cmpi eq, %arg1, %c0_i32_50 : i32
    %60 = arith.extui %59 : i1 to i32
    %c0_i32_51 = arith.constant 0 : i32
    %61 = arith.cmpi ne, %60, %c0_i32_51 : i32
    scf.if %61 {
      %c0_52 = arith.constant 0 : index
      %c0_53 = arith.constant 0 : index
      %62 = vector.load %arg7[%c0_52, %c0_53] : memref<8x286xf32, #tpu.memory_space<vmem>>, vector<8x286xf32>
      %c0_54 = arith.constant 0 : index
      %c0_55 = arith.constant 0 : index
      %c0_56 = arith.constant 0 : index
      %63 = vector.load %arg5[%c0_54, %c0_55, %c0_56] : memref<1x8x286xf32, #tpu.memory_space<vmem>>, vector<1x8x286xf32>
      %64 = vector.shape_cast %63 : vector<1x8x286xf32> to vector<8x286xf32>
      %65 = vector.shape_cast %62 : vector<8x286xf32> to vector<1x8x286xf32>
      tpu.vector_store %arg5[%c0_54, %c0_55, %c0_56], %65 {strides = array<i32>} : memref<1x8x286xf32, #tpu.memory_space<vmem>>, vector<1x8x286xf32>,
      %c0_57 = arith.constant 0 : index
      %c0_58 = arith.constant 0 : index
      %66 = vector.load %arg4[%c0_57, %c0_58] : memref<1x286xf32, #tpu.memory_space<vmem>>, vector<1x286xf32>
      %67 = vector.broadcast %66 : vector<1x286xf32> to vector<8x286xf32>
      %68 = arith.mulf %62, %67 : vector<8x286xf32>
      %cst_59 = arith.constant dense<0.000000e+00> : vector<8xf32>
      %69 = vector.multi_reduction <add>, %68, %cst_59 [1] : vector<8x286xf32> to vector<8xf32>
      %70 = vector.shape_cast %69 : vector<8xf32> to vector<8x1xf32>
      %cst_60 = arith.constant 3.906250e-03 : f32
      %71 = vector.broadcast %cst_60 : f32 to vector<8x1xf32>
      %72 = arith.mulf %70, %71 : vector<8x1xf32>
      %73 = vector.broadcast %72 : vector<8x1xf32> to vector<8x286xf32>
      %74 = arith.subf %62, %73 : vector<8x286xf32>
      %75 = vector.broadcast %66 : vector<1x286xf32> to vector<8x286xf32>
      %76 = arith.mulf %74, %75 : vector<8x286xf32>
      %77 = arith.mulf %76, %76 : vector<8x286xf32>
      %cst_61 = arith.constant dense<0.000000e+00> : vector<8xf32>
      %78 = vector.multi_reduction <add>, %77, %cst_61 [1] : vector<8x286xf32> to vector<8xf32>
      %79 = vector.shape_cast %78 : vector<8xf32> to vector<8x1xf32>
      %c0_62 = arith.constant 0 : index
      %c0_63 = arith.constant 0 : index
      %c0_64 = arith.constant 0 : index
      %80 = vector.load %arg6[%c0_62, %c0_63, %c0_64] : memref<1x8x2xf32, #tpu.memory_space<vmem>>, vector<1x8x1xf32>
      %81 = vector.shape_cast %80 : vector<1x8x1xf32> to vector<8x1xf32>
      %82 = vector.shape_cast %70 : vector<8x1xf32> to vector<1x8x1xf32>
      tpu.vector_store %arg6[%c0_62, %c0_63, %c0_64], %82 {strides = array<i32>} : memref<1x8x2xf32, #tpu.memory_space<vmem>>, vector<1x8x1xf32>,
      %c0_65 = arith.constant 0 : index
      %c0_66 = arith.constant 0 : index
      %c1_67 = arith.constant 1 : index
      %83 = vector.load %arg6[%c0_65, %c0_66, %c1_67] : memref<1x8x2xf32, #tpu.memory_space<vmem>>, vector<1x8x1xf32>
      %84 = vector.shape_cast %83 : vector<1x8x1xf32> to vector<8x1xf32>
      %85 = vector.shape_cast %79 : vector<8x1xf32> to vector<1x8x1xf32>
      tpu.vector_store %arg6[%c0_65, %c0_66, %c1_67], %85 {strides = array<i32>} : memref<1x8x2xf32, #tpu.memory_space<vmem>>, vector<1x8x1xf32>,
    } else {
    }
    return
  }
  func.func @transform_0(%arg0: i32, %arg1: i32) -> (i32, i32, i32) {
    %c0_i32 = arith.constant 0 : i32
    %c0_i32_0 = arith.constant 0 : i32
    %c0_i32_1 = arith.constant 0 : i32
    return %c0_i32, %c0_i32_0, %arg1 : i32, i32, i32
  }
  func.func @transform_1(%arg0: i32, %arg1: i32) -> (i32, i32, i32) {
    %c0_i32 = arith.constant 0 : i32
    %c0_i32_0 = arith.constant 0 : i32
    return %arg0, %arg1, %c0_i32 : i32, i32, i32
  }
  func.func @transform_2(%arg0: i32, %arg1: i32) -> (i32, i32) {
    %c0_i32 = arith.constant 0 : i32
    %c0_i32_0 = arith.constant 0 : i32
    %c0_i32_1 = arith.constant 0 : i32
    return %c0_i32, %c0_i32_0 : i32, i32
  }
  func.func @transform_3(%arg0: i32, %arg1: i32) -> (i32, i32, i32) {
    %c0_i32 = arith.constant 0 : i32
    %c0_i32_0 = arith.constant 0 : i32
    %c0_i32_1 = arith.constant 0 : i32
    return %arg0, %c0_i32, %c0_i32_0 : i32, i32, i32
  }
  func.func @transform_4(%arg0: i32, %arg1: i32) -> (i32, i32, i32) {
    %c0_i32 = arith.constant 0 : i32
    %c0_i32_0 = arith.constant 0 : i32
    %c0_i32_1 = arith.constant 0 : i32
    return %arg0, %c0_i32, %c0_i32_0 : i32, i32, i32
  }
}

module attributes {stable_mosaic.version = 11 : i64} {
  func.func @_bn_relu_kernel(%arg0: i32, %arg1: memref<1x8x286xf32, #tpu.memory_space<vmem>>, %arg2: memref<1x8x1xf32, #tpu.memory_space<vmem>>, %arg3: memref<1x8x1xf32, #tpu.memory_space<vmem>>, %arg4: memref<1x8x286xf32, #tpu.memory_space<vmem>>) attributes {dimension_semantics = [#tpu.dimension_semantics<parallel>], iteration_bounds = array<i64: 2>, scalar_prefetch = 0 : i64, scratch_operands = 0 : i64, tpu.core_type = #tpu.core_type<tc>, window_params = [{transform_indices = @transform_0, window_bounds = array<i64: 1, 8, 286>}, {pipeline_mode = #tpu.pipeline_mode<synchronous>, transform_indices = @transform_1, window_bounds = array<i64: 1, 8, 1>}, {pipeline_mode = #tpu.pipeline_mode<synchronous>, transform_indices = @transform_2, window_bounds = array<i64: 1, 8, 1>}, {transform_indices = @transform_3, window_bounds = array<i64: 1, 8, 286>}]} {
    %c0 = arith.constant 0 : index
    %c0_0 = arith.constant 0 : index
    %c0_1 = arith.constant 0 : index
    %0 = vector.load %arg1[%c0, %c0_0, %c0_1] : memref<1x8x286xf32, #tpu.memory_space<vmem>>, vector<1x8x286xf32>
    %c0_2 = arith.constant 0 : index
    %c0_3 = arith.constant 0 : index
    %c0_4 = arith.constant 0 : index
    %1 = vector.load %arg2[%c0_2, %c0_3, %c0_4] : memref<1x8x1xf32, #tpu.memory_space<vmem>>, vector<1x8x1xf32>
    %2 = vector.broadcast %1 : vector<1x8x1xf32> to vector<1x8x286xf32>
    %3 = arith.mulf %0, %2 : vector<1x8x286xf32>
    %c0_5 = arith.constant 0 : index
    %c0_6 = arith.constant 0 : index
    %c0_7 = arith.constant 0 : index
    %4 = vector.load %arg3[%c0_5, %c0_6, %c0_7] : memref<1x8x1xf32, #tpu.memory_space<vmem>>, vector<1x8x1xf32>
    %5 = vector.broadcast %4 : vector<1x8x1xf32> to vector<1x8x286xf32>
    %6 = arith.addf %3, %5 : vector<1x8x286xf32>
    %cst = arith.constant 0.000000e+00 : f32
    %7 = vector.broadcast %cst : f32 to vector<1x8x286xf32>
    %8 = arith.maximumf %6, %7 : vector<1x8x286xf32>
    %c0_8 = arith.constant 0 : index
    %c0_9 = arith.constant 0 : index
    %c0_10 = arith.constant 0 : index
    %9 = vector.load %arg4[%c0_8, %c0_9, %c0_10] : memref<1x8x286xf32, #tpu.memory_space<vmem>>, vector<1x8x286xf32>
    tpu.vector_store %arg4[%c0_8, %c0_9, %c0_10], %8 {strides = array<i32>} : memref<1x8x286xf32, #tpu.memory_space<vmem>>, vector<1x8x286xf32>,
    return
  }
  func.func @transform_0(%arg0: i32) -> (i32, i32, i32) {
    %c0_i32 = arith.constant 0 : i32
    %c0_i32_0 = arith.constant 0 : i32
    %c0_i32_1 = arith.constant 0 : i32
    return %arg0, %c0_i32, %c0_i32_0 : i32, i32, i32
  }
  func.func @transform_1(%arg0: i32) -> (i32, i32, i32) {
    %c0_i32 = arith.constant 0 : i32
    %c0_i32_0 = arith.constant 0 : i32
    %c0_i32_1 = arith.constant 0 : i32
    %c0_i32_2 = arith.constant 0 : i32
    return %c0_i32, %c0_i32_0, %c0_i32_1 : i32, i32, i32
  }
  func.func @transform_2(%arg0: i32) -> (i32, i32, i32) {
    %c0_i32 = arith.constant 0 : i32
    %c0_i32_0 = arith.constant 0 : i32
    %c0_i32_1 = arith.constant 0 : i32
    %c0_i32_2 = arith.constant 0 : i32
    return %c0_i32, %c0_i32_0, %c0_i32_1 : i32, i32, i32
  }
  func.func @transform_3(%arg0: i32) -> (i32, i32, i32) {
    %c0_i32 = arith.constant 0 : i32
    %c0_i32_0 = arith.constant 0 : i32
    %c0_i32_1 = arith.constant 0 : i32
    return %arg0, %c0_i32, %c0_i32_0 : i32, i32, i32
  }
}

</mosaic_0001>

<bundles_post_ra>
// kernel: my_cnn_decoder_forward.3
= control target key start
LH: loop header
LB: loop body
LE: loop exit
PB: predicated region body
PF: predicated region fallthrough
CT: control target
= control target key end

     0   :  { %8 = vsyncpa [#allocation3], 0  ;;  %s837_s0 = inlined_call_operand.hbm [shape: f32[2,8,286], index: 0, kind: input, shape index: {}]   ;;  %s838_s1 = inlined_call_operand.hbm [shape: f32[1,8,1], index: 1, kind: input, shape index: {}]   ;;  %s839_s2 = inlined_call_operand.hbm [shape: f32[1,8,1], index: 2, kind: input, shape index: {}]   ;;  %s840_s3 = inlined_call_operand.hbm [shape: f32[2,8,286], index: 3, kind: output, shape index: {}]  }
   0x1   :  { %10 = vsyncpa [#allocation3 + $0x1], 0 }
   0x2   :  { %11 = vsyncpa [#allocation6], 0 }
   0x3   :  { %12 = vsyncpa [#allocation4], 0 }
   0x4   :  { %14 = vsyncpa [#allocation4 + $0x1], 0  ;;  %s612_s12 = smov 0   ;;  %s614_s13 = smov 0  }
   0x5   :  { %s616_s14 = smov 0   ;;  %s618_s15 = smov 0  }
   0x6 LB: > { %s633_s16 = sadd.s32 4294967295, %s585_s15   ;;  %s344_s17 = sadd.s32 4294967294, %s585_s15   ;;  %s585_s15 = sphi %s618_s15, %s860_s15   ;;  %s581_s14 = sphi %s616_s14, %s859_s14   ;;  %s577_s13 = sphi %s614_s13, %s858_s13   ;;  %s573_s12 = sphi %s612_s12, %s857_s12  }
   0x7   : > { %p40_p0 = scmp.ne.s32.totalorder %s577_s13, %s573_s12  ;;  %p841_p1 = scmp.eq.s32.totalorder %s633_s16, 0 }
   0x8   : > { %p112_p3 = scmp.eq.s32.totalorder %s344_s17, 1  ;;  %p345_p5 = scmp.ge.s32.totalorder %s585_s15, 1 }
   0x9   : > { %p642_p4 = por %p841_p1, %p40_p0  ;;  %p119_p7 = scmp.lt.s32.totalorder %s585_s15, 3 }
   0xa   : > { %p647_p6 = por %p112_p3, %p40_p0  ;;  %s587_s21 = smov [#allocation5]  }
   0xb   : > { %s844_s18 = scalar_select %p642_p4, 1, 0 }
   0xc   : > { %s845_s19 = scalar_select %p647_p6, 1, 0 }
   0xd   : > { %p652_p8 = pnand %p345_p5, %p119_p7  ;;  %s132_s22 = sshll.u32 %s587_s21, 4  ;;  %s133_s22 = int_to_ptr.vmem [resolvable:$true] %s132_s22 }
   0xe   : > { %s588_s23 = smov [#allocation7]   ;;  %s668_s26 = sadd.s32 1, %s585_s15  }
   0xf   : > { %s846_s20 = scalar_select %p652_p8, 1, 0 }
  0x10   : > { %p372_p10 = pneg %p652_p8  ;;  %s143_s24 = sshll.u32 %s588_s23, 4  ;;  %s665_s24 = int_to_ptr.vmem [resolvable:$true] %s143_s24 }
  0x11   : > { %s24_s27 = ssub.s32 %s585_s15, %s668_s26  ;;  %s429_s30 = scalar_lea.hbm %s838_s1, 128 }
  0x12   : > { %p661_p11 = pnand %p372_p10, %p841_p1  ;;  %p430_p12 = scmp.ne.s32.totalorder %s838_s1, %s429_s30 }
  0x13   : > { %p436_p5 = scmp.lt.u32.totalorder %s429_s30, %s838_s1 }
  0x14   : > { %p431_p13 = pneg %p661_p11 }
  0x16   : > { %p432_p0 = pnand %p431_p13, %p430_p12 }
  0x18   : > { %p433_p3 = pneg %p432_p0 }
  0x1a   : > { %p438_p7 = pnand %p436_p5, %p433_p3 }
  0x1c   : > { %441 = shalt.err (!%p438_p7)
}
  0x1d   : > { %s442_s8 = scalar_lea.vmem %s133_s22, 128  ;;  %p450_p2 = scmp.lt.s32.totalorder %s133_s22, %s133_s22 }
  0x1e   : > { %p443_p10 = scmp.ne.s32.totalorder %s133_s22, %s442_s8  ;;  %p451_p6 = scmp.lt.s32.totalorder %s442_s8, %s442_s8 }
  0x20   : > { %p445_p9 = pnand %p443_p10, %p431_p13  ;;  %p452_p4 = por %p451_p6, %p450_p2 }
  0x22   : > { %p446_p1 = pneg %p445_p9 }
  0x24   : > { %p453_p8 = pnand %p452_p4, %p446_p1 }
  0x26   : > { %456 = shalt.err (!%p453_p8)
}
  0x27   : > { %375 = dma.hbm_to_vmem [thread:$0]  (!%p661_p11), %s838_s1, 128, %s133_s22, [#allocation6]  }
  0x28   : > { %s457_s21 = scalar_lea.hbm %s839_s2, 128 }
  0x29   : > { %p458_p9 = scmp.ne.s32.totalorder %s839_s2, %s457_s21  ;;  %p464_p4 = scmp.lt.u32.totalorder %s457_s21, %s839_s2 }
  0x2b   : > { %p460_p2 = pnand %p458_p9, %p431_p13 }
  0x2d   : > { %p461_p1 = pneg %p460_p2 }
  0x2f   : > { %p466_p6 = pnand %p464_p4, %p461_p1 }
  0x31   : > { %469 = shalt.err (!%p466_p6)
}
  0x32   : > { %s470_s22 = scalar_lea.vmem %s665_s24, 128  ;;  %p478_p3 = scmp.lt.s32.totalorder %s665_s24, %s665_s24 }
  0x33   : > { %p471_p8 = scmp.ne.s32.totalorder %s665_s24, %s470_s22  ;;  %p479_p5 = scmp.lt.s32.totalorder %s470_s22, %s470_s22 }
  0x35   : > { %p473_p12 = pnand %p471_p8, %p431_p13  ;;  %p480_p7 = por %p479_p5, %p478_p3 }
  0x37   : > { %p474_p0 = pneg %p473_p12 }
  0x39   : > { %p481_p10 = pnand %p480_p7, %p474_p0 }
  0x3b   : > { %484 = shalt.err (!%p481_p10)
}
  0x3c   : > { %378 = dma.hbm_to_vmem [thread:$0]  (!%p661_p11), %s839_s2, 128, %s665_s24, [#allocation6]  }
  0x3d   : > { %p25_p13 = scmp.eq.s32.totalorder %s24_s27, 0  ;;  %s27_s6 = sadd.s32 1, %s581_s14 }
  0x3e   : > { %p34_p9 = scmp.ne.s32.totalorder %s581_s14, %s577_s13  ;;  %p35_p2 = scmp.eq.s32.totalorder %s585_s15, 0 }
  0x3f   : > { %s727_s25 = scalar_select %p25_p13, %s581_s14, %s27_s6  }
  0x40   : > { %p36_p1 = por %p35_p2, %p34_p9  ;;  %p848_p4 = scmp.eq.s32.totalorder %s633_s16, 1 }
  0x41   : > { %p389_p8 = scmp.lt.s32.totalorder %s585_s15, 2  ;;  %s154_s8 = sand.u32 1, %s581_s14  }
  0x42   : > { %p731_p6 = por %p848_p4, %p34_p9  ;;  %s356_s9 = smul.u32 24, %s154_s8 }
  0x43   : > { %s357_s10 = smul.u32 384, %s585_s15  ;;  %p738_p12 = pnand %p389_p8, %p36_p1 }
  0x44   : > { %s158_s21 = scalar_lea.vmem [#allocation2], %s356_s9  ;;  %s155_s28 = scalar_lea.sflag [#allocation3], %s154_s8 }
  0x45   : > { %s745_s17 = scalar_lea.hbm %s837_s0, %s357_s10  ;;  %s166_s23 = sshll.u32 %s158_s21, 4  ;;  %s747_s23 = int_to_ptr.vmem [resolvable:$true] %s166_s23 }
  0x46   : > { %s485_s29 = scalar_lea.hbm %s745_s17, 384  ;;  %p487_p0 = pneg %p738_p12 }
  0x47   : > { %p486_p11 = scmp.ne.s32.totalorder %s745_s17, %s485_s29  ;;  %s490_s4 = scalar_lea.hbm %s837_s0, 768 }
  0x48   : > { %p491_p7 = scmp.lt.u32.totalorder %s745_s17, %s837_s0  ;;  %p492_p10 = scmp.lt.u32.totalorder %s490_s4, %s485_s29 }
  0x49   : > { %p488_p3 = pnand %p487_p0, %p486_p11  ;;  %p494_p9 = scmp.lt.u32.totalorder %s485_s29, %s745_s17 }
  0x4a   : > { %p493_p13 = por %p492_p10, %p491_p7 }
  0x4b   : > { %p489_p5 = pneg %p488_p3 }
  0x4c   : > { %p495_p2 = por %p494_p9, %p493_p13 }
  0x4e   : > { %p496_p1 = pnand %p495_p2, %p489_p5 }
  0x50   : > { %499 = shalt.err (!%p496_p1)
}
  0x51   : > { %s500_s8 = scalar_lea.vmem %s747_s23, 384  ;;  %s589_s9 = smov [#allocation2]  }
  0x52   : > { %p501_p4 = scmp.ne.s32.totalorder %s747_s23, %s500_s8  ;;  %s505_s10 = sshll.u32 %s589_s9, 4  ;;  %s506_s10 = int_to_ptr.vmem [resolvable:$false] %s505_s10 }
  0x53   : > { %s507_s24 = scalar_lea.vmem %s506_s10, 768  ;;  %p508_p3 = scmp.lt.s32.totalorder %s747_s23, %s506_s10 }
  0x54   : > { %p503_p8 = pnand %p501_p4, %p487_p0  ;;  %p509_p7 = scmp.lt.s32.totalorder %s507_s24, %s500_s8 }
  0x56   : > { %p504_p11 = pneg %p503_p8  ;;  %p510_p10 = por %p509_p7, %p508_p3 }
  0x58   : > { %p511_p13 = pnand %p510_p10, %p504_p11 }
  0x5a   : > { %514 = shalt.err (!%p511_p13)
}
  0x5b   : > { %382 = dma.hbm_to_vmem [thread:$0]  (!%p738_p12), %s745_s17, 384, %s747_s23, %s155_s28  }
  0x5c   : > { %p851_p5 = scmp.ne.s32.totalorder %s846_s20, 0 }
  0x5d   : > { %s777_s27 = sand.u32 (!%p851_p5), 1, %s577_s13   ;;  %p852_p0 = scmp.ne.s32.totalorder (!%p851_p5), %s844_s18, 0 }
  0x5e   : > { %175 = sbr.rel (%p851_p5) target bundleno = 258 (0x102), region = 32  ;;  %s178_s29 = scalar_lea.sflag (!%p851_p5), [#allocation3], %s777_s27 }
  0x5f   : > { %s358_s21 = smul.u32 (!%p851_p5), 24, %s777_s27 }
  0x61   : > { %s181_s30 = scalar_lea.vmem (!%p851_p5), [#allocation2], %s358_s21 }
  0x65   : > { %560 = dma.done.wait (%p852_p0), %s178_s29, 384  }
  0x66   : > { %562 = vsyncadd (%p852_p0), %s178_s29, 4294966912  ;;  %p853_p9 = scmp.eq.s32.totalorder %s633_s16, 0 }
  0x68   : > { %564 = dma.done.wait (%p853_p9), [#allocation6], 256   ;;  %p854_p12 = pmov %p853_p9 }
  0x69   : > { %v590_v0 = vmov 0   ;;  %v215_v1 = vld [vmem:[#allocation5] sm:$0xff]  ;;  %v224_v2 = vld [vmem:[#allocation7] sm:$0xff]  ;;  %v213_v5 = vld [vmem:[%s181_s30 + $0x8] sm:$0xff]  ;;  %s359_s18 = smul.u32 384, %s633_s16  ;;  %s211_s20 = scalar_lea.vmem [#allocation8], %s358_s21 }
  0x6a   : > { %566 = vsyncadd (%p854_p12), [#allocation6], 4294967040  ;;  %428 = vset.pattern.permute.xlu0 %v590_v0  ;;  %v212_v4 = vld [vmem:[%s181_s30] sm:$0xff]  ;;  %v214_v6 = vld [vmem:[%s181_s30 + $0x10] sm:$0xff]  ;;  %s255_s11 = sshll.u32 %s211_s20, 4  ;;  %vm238_vm0 = vcmask 244736   ;;  %s795_s11 = int_to_ptr.vmem [resolvable:$true] %s255_s11 }
  0x6b   : > { %218 = vperm.xlu0 %428, %v215_v1   ;;  %s793_s28 = scalar_lea.hbm %s840_s3, %s359_s18  ;;  %s241_s16 = scalar_lea.sflag [#allocation4], %s777_s27 }
  0x6c   : > { %s515_s22 = scalar_lea.vmem %s795_s11, 384  ;;  %s591_s4 = smov [#allocation8]  }
  0x6d   : > { %p516_p2 = scmp.ne.s32.totalorder %s795_s11, %s515_s22  ;;  %s519_s5 = sshll.u32 %s591_s4, 4  ;;  %s520_s5 = int_to_ptr.vmem [resolvable:$false] %s519_s5 }
  0x6e   : > { %s521_s6 = scalar_lea.vmem %s520_s5, 768  ;;  %p522_p8 = scmp.lt.s32.totalorder %s795_s11, %s520_s5 }
  0x6f   : > { %227 = vperm.xlu0 %428, %v224_v2   ;;  %p517_p1 = pnand %p516_p2, %p731_p6  ;;  %p523_p11 = scmp.lt.s32.totalorder %s521_s6, %s515_s22 }
  0x71   : > { %p518_p4 = pneg %p517_p1  ;;  %p524_p3 = por %p523_p11, %p522_p8 }
  0x73   : > { %p525_p7 = pnand %p524_p3, %p518_p4 }
  0xea   : > { %v219_v3 = vpop.permute.xlu0 %218 }
  0xeb   : > { %v221_v7 = vmul.f32 %v219_v3, %v212_v4  ;;  %v222_v8 = vmul.f32 %v219_v3, %v213_v5  ;;  %v223_v9 = vmul.f32 %v219_v3, %v214_v6 }
  0xee   : > { %v228_v10 = vpop.permute.xlu0 %227 }
  0xef   : > { %v230_v11 = vadd.f32 %v228_v10, %v221_v7  ;;  %v231_v12 = vadd.f32 %v228_v10, %v222_v8  ;;  %v232_v13 = vadd.f32 %v228_v10, %v223_v9 }
  0xf1   : > { %v233_v14 = vmax.f32 %v230_v11, 0.0  ;;  %v234_v15 = vmax.f32 %v231_v12, 0.0  ;;  %v235_v16 = vmax.f32 %v232_v13, 0.0 }
  0xf3   : > { %236 = vst [vmem:[%s211_s20] sm:$0xff] %v233_v14  ;;  %237 = vst [vmem:[%s211_s20 + $0x8] sm:$0xff] %v234_v15 }
  0xf4   : > { %239 = vst.msk [vmem:[%s211_s20 + $0x10] sm:$0xff] %vm238_vm0, %v235_v16 }
  0xf5   : > { %528 = shalt.err (!%p525_p7)
}
  0xf6   : > { %s529_s8 = scalar_lea.hbm %s793_s28, 384  ;;  %s533_s24 = scalar_lea.hbm %s840_s3, 768 }
  0xf7   : > { %p530_p10 = scmp.ne.s32.totalorder %s793_s28, %s529_s8  ;;  %p534_p0 = scmp.lt.u32.totalorder %s793_s28, %s840_s3 }
  0xf8   : > { %p535_p9 = scmp.lt.u32.totalorder %s533_s24, %s529_s8  ;;  %p537_p2 = scmp.lt.u32.totalorder %s529_s8, %s793_s28 }
  0xf9   : > { %p531_p13 = pnand %p530_p10, %p731_p6 }
  0xfa   : > { %p536_p12 = por %p535_p9, %p534_p0 }
  0xfb   : > { %p532_p5 = pneg %p531_p13 }
  0xfc   : > { %p538_p1 = por %p537_p2, %p536_p12 }
  0xfe   : > { %p539_p4 = pnand %p538_p1, %p532_p5 }
 0x100   : > { %542 = shalt.err (!%p539_p4)
}
 0x101   : > { %370 = dma.vmem_to_hbm [thread:$0]  (%p731_p6), %s795_s11, 384, %s793_s28, %s241_s16  }
 0x102 PF: > { %s267_s29 = sand.u32 1, %s573_s12   ;;  %p855_p8 = scmp.ne.s32.totalorder %s845_s19, 0 }
 0x103   : > { %p856_p11 = scmp.ge.s32.totalorder %s585_s15, 2  ;;  %s268_s30 = scalar_lea.sflag [#allocation4], %s267_s29 }
 0x105   : > { %p384_p3 = pnand %p856_p11, %p855_p8 }
 0x107   : > { %568 = dma.done.wait (!%p384_p3), %s268_s30, 384  }
 0x108   : > { %570 = vsyncadd (!%p384_p3), %s268_s30, 4294966912  ;;  %p17_p7 = scmp.ge.s32.totalorder %s668_s26, 4   ;;  %s857_s12 = smov %s577_s13 }
 0x109   : > { %s858_s13 = smov %s581_s14  ;;  %s859_s14 = smov %s727_s25 }
 0x10a   : > { %s860_s15 = smov %s668_s26  ;;  %19 = sbr.rel (!%p17_p7) target bundleno = 6 (0x6), region = 85 }
 0x111   :  { %273 = vsyncpa [#allocation3], 1 }
 0x112   :  { %275 = vsyncpa [#allocation3 + $0x1], 1 }
 0x113   :  { %276 = vsyncpa [#allocation6], 1 }
 0x114   :  { %277 = vsyncpa [#allocation4], 1 }
 0x115   :  { %279 = vsyncpa [#allocation4 + $0x1], 1 }

// kernel: my_cnn_decoder_forward.2
= control target key start
LH: loop header
LB: loop body
LE: loop exit
PB: predicated region body
PF: predicated region fallthrough
CT: control target
= control target key end

     0   :  { %10 = vsyncpa [#allocation4], 0  ;;  %s2921_s0 = inlined_call_operand.hbm [shape: f32[9,8,4], index: 0, kind: input, shape index: {}]   ;;  %s2922_s1 = inlined_call_operand.hbm [shape: f32[2,4,324], index: 1, kind: input, shape index: {}]   ;;  %s2923_s2 = inlined_call_operand.hbm [shape: f32[1,286], index: 2, kind: input, shape index: {}]   ;;  %s2924_s3 = inlined_call_operand.hbm [shape: f32[2,8,286], index: 3, kind: output, shape index: {0}]   ;;  %s2925_s4 = inlined_call_operand.hbm [shape: f32[2,8,2], index: 4, kind: output, shape index: {1}]  }
   0x1   :  { %11 = vsyncpa [#allocation7], 0 }
   0x2   :  { %13 = vsyncpa [#allocation7 + $0x1], 0 }
   0x3   :  { %14 = vsyncpa [#allocation5], 0 }
   0x4   :  { %16 = vsyncpa [#allocation5 + $0x1], 0 }
   0x5   :  { %17 = vsyncpa [#allocation11], 0 }
   0x6   :  { %19 = vsyncpa [#allocation11 + $0x1], 0  ;;  %s2536_s15 = smov 0   ;;  %s2538_s16 = smov 0  }
   0x7   :  { %s2540_s17 = smov 0   ;;  %s2542_s18 = smov 0  }
   0x8   :  { %s2544_s19 = smov 0   ;;  %s2546_s20 = smov 0  }
   0x9 LB: > { %s2567_s21 = sadd.s32 4294967295, %s2492_s20   ;;  %s2023_s22 = sadd.s32 4294967294, %s2492_s20   ;;  %s2492_s20 = sphi %s2546_s20, %s25_s20   ;;  %s2488_s19 = sphi %s2544_s19, %s2947_s19   ;;  %s2484_s18 = sphi %s2542_s18, %s2946_s18   ;;  %s2480_s17 = sphi %s2540_s17, %s2945_s17   ;;  %s2476_s16 = sphi %s2538_s16, %s2944_s16   ;;  %s2472_s15 = sphi %s2536_s15, %s2943_s15  }
   0xa   : > { %p85_p0 = scmp.ne.s32.totalorder %s2476_s16, %s2472_s15  ;;  %p2926_p1 = scmp.eq.s32.totalorder %s2567_s21, 0 }
   0xb   : > { %p136_p2 = scmp.eq.s32.totalorder %s2023_s22, 1  ;;  %p2024_p4 = scmp.ge.s32.totalorder %s2492_s20, 1 }
   0xc   : > { %p2575_p3 = por %p2926_p1, %p85_p0  ;;  %p169_p6 = scmp.lt.s32.totalorder %s2492_s20, 3 }
   0xd   : > { %p2580_p5 = por %p136_p2, %p85_p0  ;;  %s2494_s26 = smov [#allocation8]  }
   0xe   : > { %s2929_s23 = scalar_select %p2575_p3, 1, 0 }
   0xf   : > { %s2930_s24 = scalar_select %p2580_p5, 1, 0 }
  0x10   : > { %p2585_p7 = pnand %p2024_p4, %p169_p6  ;;  %s197_s27 = sshll.u32 %s2494_s26, 4  ;;  %s198_s27 = int_to_ptr.vmem [resolvable:$true] %s197_s27 }
  0x11   : > { %s2495_s29 = smov [#allocation3]   ;;  %s2284_s7 = scalar_lea.hbm %s2923_s2, 48 }
  0x12   : > { %s2931_s25 = scalar_select %p2585_p7, 1, 0 }
  0x13   : > { %p2197_p9 = pneg %p2585_p7  ;;  %s183_s30 = sshll.u32 %s2495_s29, 4  ;;  %s2598_s30 = int_to_ptr.vmem [resolvable:$true] %s183_s30 }
  0x14   : > { %p2285_p11 = scmp.ne.s32.totalorder %s2923_s2, %s2284_s7  ;;  %p2291_p2 = scmp.lt.u32.totalorder %s2284_s7, %s2923_s2 }
  0x15   : > { %p2594_p10 = pnand %p2197_p9, %p2926_p1 }
  0x17   : > { %p2286_p12 = pneg %p2594_p10 }
  0x19   : > { %p2287_p13 = pnand %p2286_p12, %p2285_p11 }
  0x1b   : > { %p2288_p0 = pneg %p2287_p13 }
  0x1d   : > { %p2293_p4 = pnand %p2291_p2, %p2288_p0 }
  0x1f   : > { %2296 = shalt.err (!%p2293_p4)
}
  0x20   : > { %s2297_s12 = scalar_lea.vmem %s198_s27, 48  ;;  %s2304_s13 = scalar_lea.vmem %s198_s27, 64 }
  0x21   : > { %p2298_p6 = scmp.ne.s32.totalorder %s198_s27, %s2297_s12  ;;  %p2305_p1 = scmp.lt.s32.totalorder %s198_s27, %s198_s27 }
  0x22   : > { %p2306_p5 = scmp.lt.s32.totalorder %s2304_s13, %s2297_s12 }
  0x23   : > { %p2300_p9 = pnand %p2298_p6, %p2286_p12 }
  0x24   : > { %p2307_p3 = por %p2306_p5, %p2305_p1 }
  0x25   : > { %p2301_p8 = pneg %p2300_p9 }
  0x27   : > { %p2308_p7 = pnand %p2307_p3, %p2301_p8 }
  0x29   : > { %2311 = shalt.err (!%p2308_p7)
}
  0x2a   : > { %2203 = dma.hbm_to_vmem [thread:$0]  (!%p2594_p10), %s2923_s2, 48, %s198_s27, [#allocation7]  }
  0x2b   : > { %s2312_s5 = scalar_lea.hbm %s2921_s0, 1152 }
  0x2c   : > { %p2313_p11 = scmp.ne.s32.totalorder %s2921_s0, %s2312_s5  ;;  %p2319_p5 = scmp.lt.u32.totalorder %s2312_s5, %s2921_s0 }
  0x2e   : > { %p2315_p1 = pnand %p2313_p11, %p2286_p12 }
  0x30   : > { %p2316_p3 = pneg %p2315_p1 }
  0x32   : > { %p2321_p7 = pnand %p2319_p5, %p2316_p3 }
  0x34   : > { %2324 = shalt.err (!%p2321_p7)
}
  0x35   : > { %s2325_s27 = scalar_lea.vmem %s2598_s30, 1152  ;;  %p2333_p2 = scmp.lt.s32.totalorder %s2598_s30, %s2598_s30 }
  0x36   : > { %p2326_p8 = scmp.ne.s32.totalorder %s2598_s30, %s2325_s27  ;;  %p2334_p4 = scmp.lt.s32.totalorder %s2325_s27, %s2325_s27 }
  0x38   : > { %p2328_p13 = pnand %p2326_p8, %p2286_p12  ;;  %p2335_p6 = por %p2334_p4, %p2333_p2 }
  0x3a   : > { %p2329_p0 = pneg %p2328_p13 }
  0x3c   : > { %p2336_p9 = pnand %p2335_p6, %p2329_p0 }
  0x3e   : > { %2339 = shalt.err (!%p2336_p9)
}
  0x3f   : > { %s2496_s10 = smov 128   ;;  %s2497_s11 = smov 8  }
  0x40   : > { %2200 = dma.hbm_to_vmem [thread:$0]  (!%p2594_p10), %s2921_s0, 1152, %s2598_s30, [#allocation4], %s2496_s10, %s2496_s10, %s2497_s11  }
  0x41   : > { %p130_p12 = scmp.eq.s32.totalorder %s2567_s21, 1  ;;  %s37_s14 = sadd.s32 1, %s2488_s19 }
  0x42   : > { %p39_p11 = scmp.ge.s32.totalorder %s37_s14, 2  ;;  %p79_p1 = scmp.ne.s32.totalorder %s2480_s17, %s2476_s16 }
  0x43   : > { %s72_s22 = sadd.s32 1, %s2480_s17  ;;  %p80_p3 = scmp.eq.s32.totalorder %s2492_s20, 0 }
  0x44   : > { %s2949_s14 = smov (%p39_p11, %s37_s14), 0  ;;  %p2655_p5 = por %p130_p12, %p79_p1 }
  0x45   : > { %p2217_p7 = scmp.lt.s32.totalorder %s2492_s20, 2  ;;  %s67_s28 = ssub.s32 %s2488_s19, %s2949_s14 }
  0x46   : > { %p81_p8 = por %p80_p3, %p79_p1  ;;  %p70_p13 = scmp.eq.s32.totalorder %s67_s28, 0 }
  0x47   : > { %s208_s29 = sand.u32 1, %s2492_s20   ;;  %s210_s30 = sand.u32 1, %s2480_s17  }
  0x48   : > { %s2179_s5 = smul.u32 192, %s2488_s19  ;;  %p2668_p10 = pnand %p2217_p7, %p81_p8 }
  0x49   : > { %s2666_s6 = scalar_select %p70_p13, %s2480_s17, %s72_s22  }
  0x4a   : > { %s2178_s7 = smul.u32 12, %s210_s30  ;;  %s2675_s10 = scalar_lea.hbm %s2922_s1, %s2179_s5 }
  0x4b   : > { %s209_s13 = scalar_lea.sflag [#allocation7], %s208_s29  ;;  %s2340_s22 = scalar_lea.hbm %s2675_s10, 192 }
  0x4c   : > { %s212_s11 = scalar_lea.vmem [#allocation6], %s2178_s7  ;;  %p2341_p0 = scmp.ne.s32.totalorder %s2675_s10, %s2340_s22 }
  0x4d   : > { %s222_s12 = sshll.u32 %s212_s11, 4  ;;  %p2342_p2 = pneg %p2668_p10  ;;  %s2677_s12 = int_to_ptr.vmem [resolvable:$true] %s222_s12 }
  0x4e   : > { %s2345_s5 = scalar_lea.hbm %s2922_s1, 384  ;;  %p2346_p9 = scmp.lt.u32.totalorder %s2675_s10, %s2922_s1 }
  0x4f   : > { %p2343_p4 = pnand %p2342_p2, %p2341_p0  ;;  %p2347_p12 = scmp.lt.u32.totalorder %s2345_s5, %s2340_s22 }
  0x50   : > { %p2349_p1 = scmp.lt.u32.totalorder %s2340_s22, %s2675_s10 }
  0x51   : > { %p2344_p6 = pneg %p2343_p4  ;;  %p2348_p11 = por %p2347_p12, %p2346_p9 }
  0x53   : > { %p2350_p3 = por %p2349_p1, %p2348_p11 }
  0x55   : > { %p2351_p7 = pnand %p2350_p3, %p2344_p6 }
  0x57   : > { %2354 = shalt.err (!%p2351_p7)
}
  0x58   : > { %s2355_s29 = scalar_lea.vmem %s2677_s12, 192  ;;  %s2498_s7 = smov [#allocation6]  }
  0x59   : > { %p2356_p8 = scmp.ne.s32.totalorder %s2677_s12, %s2355_s29  ;;  %s2360_s11 = sshll.u32 %s2498_s7, 4  ;;  %s2361_s11 = int_to_ptr.vmem [resolvable:$false] %s2360_s11 }
  0x5a   : > { %s2362_s28 = scalar_lea.vmem %s2361_s11, 384  ;;  %p2363_p4 = scmp.lt.s32.totalorder %s2677_s12, %s2361_s11 }
  0x5b   : > { %p2358_p13 = pnand %p2356_p8, %p2342_p2  ;;  %p2364_p9 = scmp.lt.s32.totalorder %s2362_s28, %s2355_s29 }
  0x5d   : > { %p2359_p0 = pneg %p2358_p13  ;;  %p2365_p12 = por %p2364_p9, %p2363_p4 }
  0x5f   : > { %p2366_p11 = pnand %p2365_p12, %p2359_p0 }
  0x61   : > { %2369 = shalt.err (!%p2366_p11)
}
  0x62   : > { %2207 = dma.hbm_to_vmem [thread:$0]  (!%p2668_p10), %s2675_s10, 192, %s2677_s12, %s209_s13  }
  0x63   : > { %p2935_p6 = scmp.ne.s32.totalorder %s2931_s25, 0 }
  0x64   : > { %p2936_p2 = scmp.eq.s32.totalorder (!%p2935_p6), %s2567_s21, 0 }
  0x65   : > { %231 = sbr.rel (%p2935_p6) target bundleno = 839 (0x347), region = 32 }
  0x6c   : > { %2451 = dma.done.wait (%p2936_p2), [#allocation4], 1152   ;;  %p2937_p1 = pmov %p2936_p2 }
  0x6d   : > { %s237_s22 = sand.u32 1, %s2567_s21   ;;  %s2712_s30 = sand.u32 1, %s2476_s16  }
  0x6e   : > { %2453 = vsyncadd (%p2937_p1), [#allocation4], 4294966144  ;;  %s2180_s8 = smul.u32 12, %s2712_s30  ;;  %s238_s5 = scalar_lea.sflag [#allocation7], %s237_s22 }
  0x6f   : > { %p2938_p10 = scmp.ne.s32.totalorder %s2929_s23, 0 }
  0x70   : > { %s2715_s9 = scalar_lea.vmem [#allocation6], %s2180_s8 }
  0x71   : > { %2455 = dma.done.wait (%p2938_p10), %s238_s5, 192  }
  0x72   : > { %2457 = vsyncadd (%p2938_p10), %s238_s5, 4294967104  ;;  %p2939_p3 = pmov %p2937_p1 }
  0x73   : > { %p2940_p7 = pmov %p2937_p1 }
  0x74   : > { %2459 = dma.done.wait (%p2939_p3), [#allocation7], 48  }
  0x75   : > { %2461 = vsyncadd (%p2940_p7), [#allocation7], 4294967248  ;;  %v2499_v0 = vmov 0.0   ;;  %vm2500_vm0 = vmmov 0   ;;  %v275_v1 = vld [vmem:[%s2715_s9] sm:$0xff]  ;;  %s2501_s23 = smov 127   ;;  %v1811_v60 = vlaneseq }
  0x76   : > { %2101 = vmatprep.subr.mxu1 %v2499_v0  ;;  %367 = vmatprep.mubr.f32.mxu0 %v2499_v0  ;;  %v282_v2 = vcombine.high %v275_v1, %v275_v1  ;;  %v276_v3 = vld [vmem:[%s2715_s9 + $0x8] sm:$0xf]  ;;  %s2502_s21 = smov 126   ;;  %s2503_s25 = smov 110   ;;  %vm296_vm1 = vcmask 1043456   ;;  %vm289_vm2 = vcmask 1039360  }
  0x77   : > { %2103 = vmatprep.mubr.msk.f32.mxu1 %vm2500_vm0, %v2499_v0  ;;  %283 = vrot.lane.b32.xlu1 %v275_v1, %s2501_s23  ;;  %v595_v4 = vld [vmem:[%s2715_s9 + $0x8] sm:$0xf]  ;;  %s2504_s10 = smov 109   ;;  %s2505_s12 = smov 108   ;;  %v279_v14 = vld [vmem:[#allocation3 + $0x8] sm:$0xff]  ;;  %vm292_vm3 = vcmask 31744  }
  0x78   : > { %285 = vrot.lane.b32.xlu0 %v282_v2, %s2501_s23  ;;  %v764_v5 = vld [vmem:[%s2715_s9 + $0x8] sm:$0xf]  ;;  %s2506_s13 = smov 92   ;;  %s2507_s27 = smov 91   ;;  %vm607_vm4 = vcmask 1031168   ;;  %v277_v21 = vld [vmem:[#allocation3] sm:$0xff] }
  0x79   : > { %v933_v6 = vld [vmem:[%s2715_s9 + $0x8] sm:$0xf]  ;;  %s2508_s29 = smov 90   ;;  %vm776_vm5 = vcmask 900096   ;;  %vm945_vm6 = vcmask 891904   ;;  %vm1114_vm7 = vcmask 883712  }
  0x7a   : > { %v1102_v7 = vld [vmem:[%s2715_s9 + $0x8] sm:$0xf]  ;;  %v935_v40 = vld [vmem:[#allocation3 + $0x20] sm:$0xff]  ;;  %vm1283_vm8 = vcmask 752640   ;;  %v1104_v46 = vld [vmem:[#allocation3 + $0x28] sm:$0xff]  ;;  %vm1452_vm9 = vcmask 744448  }
  0x7b   : > { %603 = vrot.lane.b32.xlu1 %v282_v2, %s2502_s21  ;;  %v1271_v8 = vld [vmem:[%s2715_s9 + $0x8] sm:$0xf]  ;;  %vm1621_vm10 = vcmask 736256   ;;  %v1611_v59 = vld [vmem:[#allocation3 + $0x40] sm:$0xff]  ;;  %v1812_v61 = vshrl.u32 %v1811_v60, 7  ;;  %s2181_s7 = smul.u32 24, %s2712_s30 }
  0x7c   : > { %287 = vrot.lane.b32.xlu0 %v276_v3, %s2501_s23  ;;  %v1440_v9 = vld [vmem:[%s2715_s9 + $0x8] sm:$0xf]  ;;  %v1809_v63 = vld [vmem:[#allocation8] sm:$0x7]  ;;  %vm1783_vm11 = vcmask 244736   ;;  %s2032_s28 = sshll.u32 %s2712_s30, 3 }
  0x7d   : > { %v1609_v10 = vld [vmem:[%s2715_s9 + $0x8] sm:$0xf]  ;;  %v1813_v62 = vsub.s32 0, %v1812_v61  ;;  %s2829_s11 = scalar_lea.vmem [#allocation9], %s2181_s7  ;;  %vm1849_vm12 = vcmask 7168   ;;  %s2837_s22 = scalar_lea.vmem [#allocation10], %s2032_s28 }
  0x7e   : > { %v597_v28 = vld [vmem:[#allocation3 + $0x10] sm:$0xff]  ;;  %v766_v34 = vld [vmem:[#allocation3 + $0x18] sm:$0xff]  ;;  %s2182_s8 = smul.u32 384, %s2484_s18  ;;  %s1873_s5 = sshll.u32 %s2829_s11, 4  ;;  %s1874_s5 = int_to_ptr.vmem [resolvable:$true] %s1873_s5 }
  0x7f   : > { %601 = vrot.lane.b32.xlu1 %v275_v1, %s2502_s21  ;;  %v1273_v51 = vld [vmem:[#allocation3 + $0x30] sm:$0xff]  ;;  %v1442_v57 = vld [vmem:[#allocation3 + $0x38] sm:$0xff] }
  0x80   : > { %605 = vrot.lane.b32.xlu0 %v595_v4, %s2502_s21  ;;  %s2846_s21 = scalar_lea.hbm %s2924_s3, %s2182_s8 }
  0x83   : > { %774 = vrot.lane.b32.xlu1 %v764_v5, %s2503_s25 }
  0x84   : > { %772 = vrot.lane.b32.xlu0 %v282_v2, %s2503_s25 }
  0x87   : > { %941 = vrot.lane.b32.xlu1 %v282_v2, %s2504_s10 }
  0x88   : > { %770 = vrot.lane.b32.xlu0 %v275_v1, %s2503_s25  ;;  %s1854_s25 = scalar_lea.sflag [#allocation5], %s2712_s30 }
  0x8b   : > { %939 = vrot.lane.b32.xlu1 %v275_v1, %s2504_s10 }
  0x8c   : > { %943 = vrot.lane.b32.xlu0 %v933_v6, %s2504_s10  ;;  %v1821_v6 = vsub.s32 2, %v1812_v61  ;;  %s2370_s10 = scalar_lea.vmem %s1874_s5, 384 }
  0x8d   : > { %p2371_p8 = scmp.ne.s32.totalorder %s1874_s5, %s2370_s10 }
  0x8f   : > { %1112 = vrot.lane.b32.xlu1 %v1102_v7, %s2505_s12  ;;  %p2372_p13 = pnand %p2371_p8, %p2655_p5 }
  0x90   : > { %1110 = vrot.lane.b32.xlu0 %v282_v2, %s2505_s12 }
  0x91   : > { %p2373_p0 = pneg %p2372_p13 }
  0x93   : > { %1279 = vrot.lane.b32.xlu1 %v282_v2, %s2506_s13 }
  0x94   : > { %1108 = vrot.lane.b32.xlu0 %v275_v1, %s2505_s12  ;;  %s2509_s12 = smov [#allocation9]  }
  0x97   : > { %1277 = vrot.lane.b32.xlu1 %v275_v1, %s2506_s13 }
  0x98   : > { %1281 = vrot.lane.b32.xlu0 %v1271_v8, %s2506_s13  ;;  %s2374_s13 = sshll.u32 %s2509_s12, 4  ;;  %s2375_s13 = int_to_ptr.vmem [resolvable:$false] %s2374_s13 }
  0x99   : > { %p2377_p4 = scmp.lt.s32.totalorder %s1874_s5, %s2375_s13 }
  0x9b   : > { %1450 = vrot.lane.b32.xlu1 %v1440_v9, %s2507_s27 }
  0x9c   : > { %1448 = vrot.lane.b32.xlu0 %v282_v2, %s2507_s27 }
  0x9f   : > { %1617 = vrot.lane.b32.xlu1 %v282_v2, %s2508_s29 }
  0xa0   : > { %1446 = vrot.lane.b32.xlu0 %v275_v1, %s2507_s27  ;;  %s2376_s27 = scalar_lea.vmem %s2375_s13, 768 }
  0xa1   : > { %p2378_p9 = scmp.lt.s32.totalorder %s2376_s27, %s2370_s10 }
  0xa3   : > { %1615 = vrot.lane.b32.xlu1 %v275_v1, %s2508_s29  ;;  %p2379_p12 = por %p2378_p9, %p2377_p4 }
  0xa4   : > { %1619 = vrot.lane.b32.xlu0 %v1609_v10, %s2508_s29  ;;  %v1822_v10 = vrot.slane %v1809_v63, %v1821_v6 }
  0xa5   : > { %p2380_p11 = pnand %p2379_p12, %p2373_p0 }
  0xe9   : > { %v284_v11 = vpop.permute.xlu1 %283 }
  0xea   : > { %v286_v12 = vpop.permute.xlu0 %285 }
  0xeb   : > { %v290_v17 = vsel %vm289_vm2, %v284_v11, %v286_v12 }
  0xed   : > { %v604_v13 = vpop.permute.xlu1 %603 }
  0xee   : > { %v288_v15 = vpop.permute.xlu0 %287 }
  0xef   : > { %2102 = vmatpush3.msk.msra.mxu1 %vm296_vm1, %v288_v15  ;;  %v291_v16 = vsel %vm289_vm2, %v286_v12, %v288_v15 }
  0xf0   : > { %2033 = vmatprep.subr.msk.mxu0 %vm296_vm1, %v291_v16  ;;  %2104 = vmatmul.mubr.msk.f32.vlgmr.msra.gmra.mrb[0].mxu1 %vm292_vm3, %v279_v14 }
  0xf1   : > { %2034 = vmatpush1.msk.msra.mxu0 %vm296_vm1, %v290_v17  ;;  %2106 = vmatprep.subr.mxu1 %v2499_v0  ;;  %v602_v18 = vpop.permute.xlu1 %601 }
  0xf2   : > { %2035 = vmatmul.mubr.msk.f32.vlgmr.msra.gmra.mrb[0].mxu0 %vm292_vm3, %v279_v14  ;;  %2038 = vmatprep.subr.msk.mxu0 %vm296_vm1, %v282_v2  ;;  %v606_v19 = vpop.permute.xlu0 %605  ;;  %v608_v24 = vsel %vm607_vm4, %v602_v18, %v604_v13  ;;  %v1814_v2 = vrot.slane %v1809_v63, %v1813_v62 }
  0xf3   : > { %2039 = vmatpush1.msk.msra.mxu0 %vm296_vm1, %v275_v1  ;;  %2107 = vmatpush3.msk.msra.mxu1 %vm296_vm1, %v276_v3  ;;  %v609_v20 = vsel %vm607_vm4, %v604_v13, %v606_v19  ;;  %v1817_v1 = vsub.s32 1, %v1812_v61 }
  0xf4   : > { %2108 = vmatprep.mubr.msk.f32.mxu1 %vm2500_vm0, %v2499_v0  ;;  %2043 = vmatprep.subr.msk.mxu0 %vm296_vm1, %v609_v20 }
  0xf5   : > { %2111 = vmatprep.subr.mxu1 %v2499_v0  ;;  %517 = vmatprep.mubr.f32.mxu0 %v2499_v0  ;;  %v775_v23 = vpop.permute.xlu1 %774  ;;  %v1818_v4 = vrot.slane %v1809_v63, %v1817_v1 }
  0xf6   : > { %v773_v22 = vpop.permute.xlu0 %772 }
  0xf7   : > { %v778_v25 = vsel %vm776_vm5, %v773_v22, %v775_v23 }
  0xf8   : > { %2109 = vmatmul.mubr.msk.f32.vlgmr.msra.gmra.mrb[0].mxu1 %vm292_vm3, %v277_v21 }
  0xf9   : > { %2112 = vmatpush3.msk.msra.mxu1 %vm296_vm1, %v606_v19  ;;  %2113 = vmatprep.mubr.msk.f32.mxu1 %vm2500_vm0, %v2499_v0  ;;  %v942_v27 = vpop.permute.xlu1 %941 }
  0xfa   : > { %2040 = vmatmul.mubr.msk.f32.vlgmr.msra.gmra.mrb[0].mxu0 %vm292_vm3, %v277_v21  ;;  %v771_v26 = vpop.permute.xlu0 %770  ;;  %2116 = vmatprep.subr.mxu1 %v2499_v0 }
  0xfb   : > { %2044 = vmatpush1.msk.msra.mxu0 %vm296_vm1, %v608_v24  ;;  %683 = vmatprep.mubr.f32.mxu0 %v2499_v0  ;;  %v777_v30 = vsel %vm776_vm5, %v771_v26, %v773_v22 }
  0xfc   : > { %2048 = vmatprep.subr.msk.mxu0 %vm296_vm1, %v778_v25 }
  0xfd   : > { %v940_v32 = vpop.permute.xlu1 %939 }
  0xfe   : > { %v944_v29 = vpop.permute.xlu0 %943  ;;  %v946_v36 = vsel %vm945_vm6, %v940_v32, %v942_v27 }
  0xff   : > { %v947_v31 = vsel %vm945_vm6, %v942_v27, %v944_v29 }
 0x100   : > { %2114 = vmatmul.mubr.msk.f32.vlgmr.msra.gmra.mrb[0].mxu1 %vm292_vm3, %v597_v28 }
 0x101   : > { %2117 = vmatpush3.msk.msra.mxu1 %vm296_vm1, %v775_v23  ;;  %2118 = vmatprep.mubr.msk.f32.mxu1 %vm2500_vm0, %v2499_v0  ;;  %v1113_v35 = vpop.permute.xlu1 %1112 }
 0x102   : > { %2045 = vmatmul.mubr.msk.f32.vlgmr.msra.gmra.mrb[0].mxu0 %vm292_vm3, %v597_v28  ;;  %2121 = vmatprep.subr.mxu1 %v2499_v0  ;;  %v1111_v33 = vpop.permute.xlu0 %1110 }
 0x103   : > { %2049 = vmatpush1.msk.msra.mxu0 %vm296_vm1, %v777_v30  ;;  %852 = vmatprep.mubr.f32.mxu0 %v2499_v0  ;;  %v1116_v37 = vsel %vm1114_vm7, %v1111_v33, %v1113_v35 }
 0x104   : > { %2053 = vmatprep.subr.msk.mxu0 %vm296_vm1, %v947_v31 }
 0x105   : > { %v1280_v39 = vpop.permute.xlu1 %1279 }
 0x106   : > { %v1109_v38 = vpop.permute.xlu0 %1108 }
 0x107   : > { %v1115_v42 = vsel %vm1114_vm7, %v1109_v38, %v1111_v33 }
 0x108   : > { %2119 = vmatmul.mubr.msk.f32.vlgmr.msra.gmra.mrb[0].mxu1 %vm292_vm3, %v766_v34 }
 0x109   : > { %2122 = vmatpush3.msk.msra.mxu1 %vm296_vm1, %v944_v29  ;;  %2123 = vmatprep.mubr.msk.f32.mxu1 %vm2500_vm0, %v2499_v0  ;;  %v1278_v44 = vpop.permute.xlu1 %1277 }
 0x10a   : > { %2050 = vmatmul.mubr.msk.f32.vlgmr.msra.gmra.mrb[0].mxu0 %vm292_vm3, %v766_v34  ;;  %2126 = vmatprep.subr.mxu1 %v2499_v0  ;;  %v1282_v41 = vpop.permute.xlu0 %1281  ;;  %v1284_v48 = vsel %vm1283_vm8, %v1278_v44, %v1280_v39 }
 0x10b   : > { %2054 = vmatpush1.msk.msra.mxu0 %vm296_vm1, %v946_v36  ;;  %1021 = vmatprep.mubr.f32.mxu0 %v2499_v0  ;;  %v1285_v43 = vsel %vm1283_vm8, %v1280_v39, %v1282_v41 }
 0x10c   : > { %2058 = vmatprep.subr.msk.mxu0 %vm296_vm1, %v1116_v37 }
 0x10d   : > { %v1451_v47 = vpop.permute.xlu1 %1450 }
 0x10e   : > { %v1449_v45 = vpop.permute.xlu0 %1448 }
 0x10f   : > { %v1454_v49 = vsel %vm1452_vm9, %v1449_v45, %v1451_v47 }
 0x110   : > { %2124 = vmatmul.mubr.msk.f32.vlgmr.msra.gmra.mrb[0].mxu1 %vm292_vm3, %v935_v40 }
 0x111   : > { %2127 = vmatpush3.msk.msra.mxu1 %vm296_vm1, %v1113_v35  ;;  %2128 = vmatprep.mubr.msk.f32.mxu1 %vm2500_vm0, %v2499_v0  ;;  %v1618_v53 = vpop.permute.xlu1 %1617 }
 0x112   : > { %2055 = vmatmul.mubr.msk.f32.vlgmr.msra.gmra.mrb[0].mxu0 %vm292_vm3, %v935_v40  ;;  %2131 = vmatprep.subr.mxu1 %v2499_v0  ;;  %v1447_v50 = vpop.permute.xlu0 %1446 }
 0x113   : > { %2059 = vmatpush1.msk.msra.mxu0 %vm296_vm1, %v1115_v42  ;;  %1190 = vmatprep.mubr.f32.mxu0 %v2499_v0  ;;  %v1453_v54 = vsel %vm1452_vm9, %v1447_v50, %v1449_v45 }
 0x114   : > { %2063 = vmatprep.subr.msk.mxu0 %vm296_vm1, %v1285_v43 }
 0x115   : > { %v1616_v56 = vpop.permute.xlu1 %1615 }
 0x116   : > { %v1620_v52 = vpop.permute.xlu0 %1619  ;;  %v1622_v58 = vsel %vm1621_vm10, %v1616_v56, %v1618_v53 }
 0x117   : > { %v1623_v55 = vsel %vm1621_vm10, %v1618_v53, %v1620_v52 }
 0x118   : > { %2129 = vmatmul.mubr.msk.f32.vlgmr.msra.gmra.mrb[0].mxu1 %vm292_vm3, %v1104_v46 }
 0x119   : > { %2132 = vmatpush3.msk.msra.mxu1 %vm296_vm1, %v1282_v41  ;;  %2133 = vmatprep.mubr.msk.f32.mxu1 %vm2500_vm0, %v2499_v0 }
 0x11a   : > { %2060 = vmatmul.mubr.msk.f32.vlgmr.msra.gmra.mrb[0].mxu0 %vm292_vm3, %v1104_v46  ;;  %2136 = vmatprep.subr.mxu1 %v2499_v0 }
 0x11b   : > { %2064 = vmatpush1.msk.msra.mxu0 %vm296_vm1, %v1284_v48  ;;  %1359 = vmatprep.mubr.f32.mxu0 %v2499_v0 }
 0x11c   : > { %2068 = vmatprep.subr.msk.mxu0 %vm296_vm1, %v1454_v49 }
 0x120   : > { %2134 = vmatmul.mubr.msk.f32.vlgmr.msra.gmra.mrb[0].mxu1 %vm292_vm3, %v1273_v51 }
 0x121   : > { %2137 = vmatpush3.msk.msra.mxu1 %vm296_vm1, %v1451_v47  ;;  %2138 = vmatprep.mubr.msk.f32.mxu1 %vm2500_vm0, %v2499_v0 }
 0x122   : > { %2065 = vmatmul.mubr.msk.f32.vlgmr.msra.gmra.mrb[0].mxu0 %vm292_vm3, %v1273_v51  ;;  %2141 = vmatprep.subr.mxu1 %v2499_v0 }
 0x123   : > { %2069 = vmatpush1.msk.msra.mxu0 %vm296_vm1, %v1453_v54  ;;  %1528 = vmatprep.mubr.f32.mxu0 %v2499_v0 }
 0x124   : > { %2073 = vmatprep.subr.msk.mxu0 %vm296_vm1, %v1623_v55 }
 0x128   : > { %2139 = vmatmul.mubr.msk.f32.vlgmr.msra.gmra.mrb[0].mxu1 %vm292_vm3, %v1442_v57 }
 0x129   : > { %2142 = vmatpush3.msk.msra.mxu1 %vm296_vm1, %v1620_v52  ;;  %2143 = vmatprep.mubr.msk.f32.mxu1 %vm2500_vm0, %v2499_v0 }
 0x12a   : > { %2070 = vmatmul.mubr.msk.f32.vlgmr.msra.gmra.mrb[0].mxu0 %vm292_vm3, %v1442_v57 }
 0x12b   : > { %2074 = vmatpush1.msk.msra.mxu0 %vm296_vm1, %v1622_v58  ;;  %1697 = vmatprep.mubr.f32.mxu0 %v2499_v0 }
 0x130   : > { %2144 = vmatmul.mubr.msk.f32.vlgmr.msra.gmra.mrb[0].mxu1 %vm292_vm3, %v1611_v59 }
 0x132   : > { %2075 = vmatmul.mubr.msk.f32.vlgmr.msra.gmra.mrb[0].mxu0 %vm292_vm3, %v1611_v59 }
 0x203   : > { %v1770_v3 = vpop.f32.mrb[0].mxu1 }
 0x204   : > { %1784 = vst.msk [vmem:[#allocation2 + $0x10] sm:$0xff] %vm1783_vm11, %v1770_v3  ;;  %v2145_v5 = vpop.f32.mrb[1].mxu1 }
 0x205   : > { %v1699_v0 = vpop.f32.mrb[0].mxu0 }
 0x206   : > { %v1701_v7 = vpop.f32.mrb[1].mxu0  ;;  %1805 = vst [vmem:[%s2829_s11] sm:$0xff] %v1699_v0  ;;  %v1826_v8 = vmul.f32 %v1814_v2, %v1699_v0 }
 0x207   : > { %v1827_v9 = vmul.f32 %v1818_v4, %v1701_v7  ;;  %1806 = vst [vmem:[%s2829_s11 + $0x8] sm:$0xff] %v1701_v7 }
 0x209   : > { %v1829_v11 = vadd.f32 %v1827_v9, %v1826_v8 }
 0x20b   : > { %v1804_v12 = vld [vmem:[#allocation2 + $0x10] sm:$0xff] }
 0x20c   : > { %1808 = vst.msk [vmem:[%s2829_s11 + $0x10] sm:$0xff] %vm1783_vm11, %v1804_v12  ;;  %v1828_v13 = vmul.f32 %v1822_v10, %v1804_v12 }
 0x20e   : > { %v1830_v14 = vsel %vm1783_vm11, %v1828_v13, 0.0 }
 0x20f   : > { %v1831_v15 = vadd.f32 %v1830_v14, %v1829_v11 }
 0x211   : > { %1832 = vadd.xlane.f32.xlu0 %v1831_v15 }
 0x29e   : > { %v1833_v16 = vpop.xlane.xlu0 %1832 }
 0x29f   : > { %v1834_v17 = vmul.f32 0.00390625, %v1833_v16  ;;  %1850 = vst.msk [vmem:[%s2837_s22] sm:$0xff] %vm1849_vm12, %v1833_v16 }
 0x2a1   : > { %v1835_v18 = vsub.f32 %v1699_v0, %v1834_v17  ;;  %v1836_v19 = vsub.f32 %v1701_v7, %v1834_v17  ;;  %v1837_v20 = vsub.f32 %v1804_v12, %v1834_v17 }
 0x2a3   : > { %v1838_v21 = vmul.f32 %v1835_v18, %v1814_v2  ;;  %v1839_v22 = vmul.f32 %v1836_v19, %v1818_v4  ;;  %v1840_v23 = vmul.f32 %v1837_v20, %v1822_v10 }
 0x2a5   : > { %v1841_v24 = vmul.f32 %v1838_v21, %v1838_v21  ;;  %v1842_v25 = vmul.f32 %v1839_v22, %v1839_v22  ;;  %v1843_v26 = vmul.f32 %v1840_v23, %v1840_v23 }
 0x2a7   : > { %v1844_v27 = vadd.f32 %v1842_v25, %v1841_v24  ;;  %v1845_v28 = vsel %vm1783_vm11, %v1843_v26, 0.0 }
 0x2a9   : > { %v1846_v29 = vadd.f32 %v1845_v28, %v1844_v27 }
 0x2ab   : > { %1847 = vadd.xlane.f32.xlu1 %v1846_v29 }
 0x2ac   : > { %2383 = shalt.err (!%p2380_p11)
}
 0x2ad   : > { %s2384_s29 = scalar_lea.hbm %s2846_s21, 384  ;;  %s2388_s28 = scalar_lea.hbm %s2924_s3, 768 }
 0x2ae   : > { %p2385_p6 = scmp.ne.s32.totalorder %s2846_s21, %s2384_s29  ;;  %p2389_p10 = scmp.lt.u32.totalorder %s2846_s21, %s2924_s3 }
 0x2af   : > { %p2390_p3 = scmp.lt.u32.totalorder %s2388_s28, %s2384_s29  ;;  %p2392_p8 = scmp.lt.u32.totalorder %s2384_s29, %s2846_s21 }
 0x2b0   : > { %p2386_p2 = pnand %p2385_p6, %p2655_p5 }
 0x2b1   : > { %p2391_p7 = por %p2390_p3, %p2389_p10 }
 0x2b2   : > { %p2387_p1 = pneg %p2386_p2 }
 0x2b3   : > { %p2393_p13 = por %p2392_p8, %p2391_p7 }
 0x2b5   : > { %p2394_p0 = pnand %p2393_p13, %p2387_p1 }
 0x2b7   : > { %2397 = shalt.err (!%p2394_p0)
}
 0x2b8   : > { %2193 = dma.vmem_to_hbm [thread:$0]  (%p2655_p5), %s1874_s5, 384, %s2846_s21, %s1854_s25   ;;  %vm1851_vm13 = vcmask 15368  }
 0x2b9   : > { %s2080_s23 = sshll.u32 %s2484_s18, 7  ;;  %s1886_s10 = sshll.u32 %s2837_s22, 4  ;;  %s2873_s10 = int_to_ptr.vmem [resolvable:$true] %s1886_s10 }
 0x2ba   : > { %s2871_s27 = scalar_lea.hbm %s2925_s4, %s2080_s23  ;;  %s1859_s29 = scalar_lea.sflag [#allocation11], %s2712_s30 }
 0x2bb   : > { %s2398_s7 = scalar_lea.vmem %s2873_s10, 128  ;;  %s2510_s18 = smov [#allocation10]  }
 0x2bc   : > { %p2399_p4 = scmp.ne.s32.totalorder %s2873_s10, %s2398_s7  ;;  %s2402_s5 = sshll.u32 %s2510_s18, 4  ;;  %s2403_s5 = int_to_ptr.vmem [resolvable:$false] %s2402_s5 }
 0x2bd   : > { %s2404_s21 = scalar_lea.vmem %s2403_s5, 256  ;;  %p2405_p11 = scmp.lt.s32.totalorder %s2873_s10, %s2403_s5 }
 0x2be   : > { %p2400_p9 = pnand %p2399_p4, %p2655_p5  ;;  %p2406_p6 = scmp.lt.s32.totalorder %s2404_s21, %s2398_s7 }
 0x2c0   : > { %p2401_p12 = pneg %p2400_p9  ;;  %p2407_p2 = por %p2406_p6, %p2405_p11 }
 0x2c2   : > { %p2408_p1 = pnand %p2407_p2, %p2401_p12 }
 0x338   : > { %v1848_v30 = vpop.xlane.xlu1 %1847 }
 0x339   : > { %1852 = vst.msk [vmem:[%s2837_s22] sm:$0xff] %vm1851_vm13, %v1848_v30 }
 0x33a   : > { %2411 = shalt.err (!%p2408_p1)
}
 0x33b   : > { %s2412_s30 = scalar_lea.hbm %s2871_s27, 128  ;;  %s2416_s11 = scalar_lea.hbm %s2925_s4, 256 }
 0x33c   : > { %p2413_p10 = scmp.ne.s32.totalorder %s2871_s27, %s2412_s30  ;;  %p2417_p8 = scmp.lt.u32.totalorder %s2871_s27, %s2925_s4 }
 0x33d   : > { %p2418_p13 = scmp.lt.u32.totalorder %s2416_s11, %s2412_s30  ;;  %p2420_p4 = scmp.lt.u32.totalorder %s2412_s30, %s2871_s27 }
 0x33e   : > { %p2414_p3 = pnand %p2413_p10, %p2655_p5 }
 0x33f   : > { %p2419_p0 = por %p2418_p13, %p2417_p8 }
 0x340   : > { %p2415_p7 = pneg %p2414_p3 }
 0x341   : > { %p2421_p9 = por %p2420_p4, %p2419_p0 }
 0x343   : > { %p2422_p12 = pnand %p2421_p9, %p2415_p7 }
 0x345   : > { %2425 = shalt.err (!%p2422_p12)
}
 0x346   : > { %2194 = dma.vmem_to_hbm [thread:$0]  (%p2655_p5), %s2873_s10, 128, %s2871_s27, %s1859_s29  }
 0x347 PF: > { %s1898_s9 = sand.u32 1, %s2472_s15   ;;  %p2941_p11 = scmp.ne.s32.totalorder %s2930_s24, 0 }
 0x348   : > { %p2942_p6 = scmp.ge.s32.totalorder %s2492_s20, 2  ;;  %s1899_s23 = scalar_lea.sflag [#allocation5], %s1898_s9 }
 0x34a   : > { %p2209_p2 = pnand %p2942_p6, %p2941_p11 }
 0x34c   : > { %2463 = dma.done.wait (!%p2209_p2), %s1899_s23, 384  }
 0x34d   : > { %2465 = vsyncadd (!%p2209_p2), %s1899_s23, 4294966912  ;;  %s1908_s12 = scalar_lea.sflag [#allocation11], %s1898_s9 }
 0x34e   : > { %2467 = dma.done.wait (!%p2209_p2), %s1908_s12, 128  }
 0x34f   : > { %2469 = vsyncadd (!%p2209_p2), %s1908_s12, 4294967168  ;;  %s25_s20 = sadd.s32 1, %s2492_s20   ;;  %s2943_s15 = smov %s2476_s16 }
 0x350   : > { %p22_p1 = scmp.ge.s32.totalorder %s25_s20, 4   ;;  %s2944_s16 = smov %s2480_s17 }
 0x351   : > { %s2945_s17 = smov %s2666_s6  ;;  %s2946_s18 = smov %s2488_s19 }
 0x352   : > { %s2947_s19 = smov %s2949_s14  ;;  %24 = sbr.rel (!%p22_p1) target bundleno = 9 (0x9), region = 124 }
 0x359   :  { %1913 = vsyncpa [#allocation4], 1 }
 0x35a   :  { %1915 = vsyncpa [#allocation4 + $0x1], 1 }
 0x35b   :  { %1916 = vsyncpa [#allocation7], 1 }
 0x35c   :  { %1918 = vsyncpa [#allocation7 + $0x1], 1 }
 0x35d   :  { %1919 = vsyncpa [#allocation5], 1 }
 0x35e   :  { %1921 = vsyncpa [#allocation5 + $0x1], 1 }
 0x35f   :  { %1922 = vsyncpa [#allocation11], 1 }
 0x360   :  { %1924 = vsyncpa [#allocation11 + $0x1], 1 }

</bundles_post_ra>
